<compile_context>
chip_gen: v6e
topology: v6e:2x2x1
jax: 0.10.0
libtpu: 0.0.40
codegen_flags: <defaults>
</compile_context>

<pallas_src>
import math

import jax
import jax.numpy as jnp
import numpy as np
from jax.experimental import pallas as pl
from jax.experimental.pallas import tpu as pltpu


def _round_up(x, m):
    return ((x + m - 1) // m) * m


def _cdiv(a, b):
    return -(-a // b)


def mlp_kernel(x_ref, w1_ref, b1_ref, w2_ref, b2_ref, w3_ref, b3_ref, o_ref):
    """Fused 3-layer MLP for one batch tile.

    x_ref : (TILE_B, D)        w1_ref : (D, H)     b1_ref : (1, H)
    w2_ref: (H, H2)            b2_ref : (1, H2)
    w3_ref: (H2, C_PAD)        b3_ref : (1, C_PAD)   (padded to 128 lanes)
    o_ref : (TILE_B, C_OUT)    C_OUT is num_classes (narrow HBM writeback,
                               default) or C_PAD (lane-dense variant).

    Weights arrive pre-transposed to (in, out) so every matmul is a plain
    x @ W with no in-kernel XLU transpose.
    """
    prec = jax.lax.Precision.HIGHEST

    x = x_ref[...]
    h1 = jnp.dot(x, w1_ref[...], preferred_element_type=jnp.float32,
                 precision=prec)
    h1 = jnp.maximum(h1 + b1_ref[...], 0.0)

    h2 = jnp.dot(h1.astype(w2_ref.dtype), w2_ref[...],
                 preferred_element_type=jnp.float32, precision=prec)
    h2 = jnp.maximum(h2 + b2_ref[...], 0.0)

    out = jnp.dot(h2.astype(w3_ref.dtype), w3_ref[...],
                  preferred_element_type=jnp.float32, precision=prec)
    out = out + b3_ref[...]

    # Static slice: drops the zero-weight lane padding when the HBM output is
    # num_classes wide; a no-op in the lane-dense variant.
    o_ref[...] = out[:, : o_ref.shape[1]].astype(o_ref.dtype)


def _vmem_estimate_bytes(tb, in_dim, hidden, hidden2, c_pad, out_cols,
                         x_itemsize, w_itemsize):
    """Rough per-step VMEM footprint (double-buffered streams + residents)."""
    lane = 128

    def padc(c):
        return _round_up(max(int(c), 1), lane)

    est = 0
    est += 2 * tb * padc(in_dim) * x_itemsize                     # x tiles
    est += 2 * tb * padc(out_cols) * 4                            # out tiles
    est += tb * (padc(hidden) + padc(hidden2)) * 4                # h1 / h2
    w_elems = (in_dim * padc(hidden) + hidden * padc(hidden2)
               + hidden2 * c_pad + padc(hidden) + padc(hidden2) + c_pad)
    est += 2 * w_elems * w_itemsize                               # weights/bias
    return est


def custom_classification_mlp(x, params, *, tile_b=2048,
                              lane_dense_output=False, use_bf16=False):
    """Runs the fused MLP Pallas kernel.

    x      : [batch, input_dim] float32
    params : dict with w1 (H, D), b1 (1, H), w2 (H2, H), b2 (1, H2),
             w3 (C, H2), b3 (1, C)   — torch nn.Linear layout (out, in).
    """
    batch, in_dim = x.shape
    hidden = params["w1"].shape[0]
    hidden2 = params["w2"].shape[0]
    num_classes = params["w3"].shape[0]

    # ---- one-time layout plumbing (outside the kernel hot path) -------------
    # Transpose torch (out, in) weights -> (in, out) so the kernel never uses .T
    w_dtype = jnp.bfloat16 if use_bf16 else jnp.float32
    w1 = params["w1"].T.astype(w_dtype)                 # (D, H)
    w2 = params["w2"].T.astype(w_dtype)                 # (H, H2)
    w3 = params["w3"].T.astype(w_dtype)                 # (H2, C)
    b1 = params["b1"].reshape(1, hidden).astype(jnp.float32)
    b2 = params["b2"].reshape(1, hidden2).astype(jnp.float32)
    b3 = params["b3"].reshape(1, num_classes).astype(jnp.float32)

    # Pad the head (weights + bias) out-dim to 128 lanes so the last matmul is
    # lane-dense regardless of how wide the HBM output is.
    c_pad = _round_up(max(num_classes, 1), 128)
    w3p = jnp.zeros((hidden2, c_pad), w3.dtype).at[:, :num_classes].set(w3)
    b3p = jnp.zeros((1, c_pad), jnp.float32).at[:, :num_classes].set(b3)

    # HBM output width: narrow (num_classes) by default -> ~13x less write
    # traffic on this write-dominated kernel; padded variant kept for sweeps.
    out_cols = c_pad if lane_dense_output else num_classes

    # ---- batch tiling --------------------------------------------------------
    # n_tiles = cdiv(batch, tile_b); tb = round_up(cdiv(batch, n_tiles), 8);
    # padding bounded by < 8 rows per tile.  Force >= 2 (even) steps when the
    # batch is big enough so v7x's two TensorCores both get work.
    n_tiles = _cdiv(batch, max(tile_b, 8))
    if batch >= 16:
        n_tiles = max(n_tiles, 2)
        if n_tiles % 2:
            n_tiles += 1
    tb = _round_up(_cdiv(batch, n_tiles), 8)
    batch_pad = n_tiles * tb

    x_in = x.astype(w_dtype) if use_bf16 else x
    if batch_pad != batch:
        x_in = jnp.zeros((batch_pad, in_dim), x_in.dtype).at[:batch].set(x_in)

    # ---- compiler params -----------------------------------------------------
    compiler_kwargs = dict(dimension_semantics=("parallel",))
    est = _vmem_estimate_bytes(tb, in_dim, hidden, hidden2, c_pad, out_cols,
                               x_in.dtype.itemsize, w1.dtype.itemsize)
    if est > 14 * 1024 * 1024:      # only needed if tiles grow past v5e default
        compiler_kwargs["vmem_limit_bytes"] = min(int(est * 1.5), 48 * 1024 * 1024)

    out_padded = pl.pallas_call(
        mlp_kernel,
        out_shape=jax.ShapeDtypeStruct((batch_pad, out_cols), jnp.float32),
        grid_spec=pltpu.PrefetchScalarGridSpec(
            num_scalar_prefetch=0,
            grid=(n_tiles,),
            in_specs=[
                pl.BlockSpec((tb, in_dim), lambda i: (i, 0)),       # x tile
                pl.BlockSpec((in_dim, hidden), lambda i: (0, 0)),   # w1 (resident)
                pl.BlockSpec((1, hidden), lambda i: (0, 0)),        # b1
                pl.BlockSpec((hidden, hidden2), lambda i: (0, 0)),  # w2
                pl.BlockSpec((1, hidden2), lambda i: (0, 0)),       # b2
                pl.BlockSpec((hidden2, c_pad), lambda i: (0, 0)),   # w3 (padded)
                pl.BlockSpec((1, c_pad), lambda i: (0, 0)),         # b3 (padded)
            ],
            out_specs=pl.BlockSpec((tb, out_cols), lambda i: (i, 0)),
        ),
        compiler_params=pltpu.CompilerParams(**compiler_kwargs),
    )(x_in, w1, b1, w2, b2, w3p, b3p)

    # Drop batch padding (and lane padding in the lane-dense variant).
    return out_padded[:batch, :num_classes]


def init_params(key, input_dim, hidden_dim, num_classes):
    """Deterministic init mirroring torch.nn.Linear default:
    U(-1/sqrt(fan_in), 1/sqrt(fan_in)) for both weight and bias."""
    dims = [
        (hidden_dim, input_dim),
        (hidden_dim // 2, hidden_dim),
        (num_classes, hidden_dim // 2),
    ]
    params = {}
    for i, (out_d, in_d) in enumerate(dims, start=1):
        key, kw, kb = jax.random.split(key, 3)
        bound = 1.0 / math.sqrt(in_d)
        params[f"w{i}"] = jax.random.uniform(
            kw, (out_d, in_d), jnp.float32, minval=-bound, maxval=bound)
        params[f"b{i}"] = jax.random.uniform(
            kb, (1, out_d), jnp.float32, minval=-bound, maxval=bound)
    return params


def reference_mlp(x, params):
    prec = jax.lax.Precision.HIGHEST
    h1 = jnp.maximum(
        jnp.dot(x, params["w1"].T, precision=prec) + params["b1"], 0.0)
    h2 = jnp.maximum(
        jnp.dot(h1, params["w2"].T, precision=prec) + params["b2"], 0.0)
    return jnp.dot(h2, params["w3"].T, precision=prec) + params["b3"]


if __name__ == "__main__":
    # Small shapes consistent with the module's forward.
    batch, input_dim, hidden_dim, num_classes = 8, 32, 64, 10

    key = jax.random.PRNGKey(0)
    key, kx = jax.random.split(key)
    x = jax.random.normal(kx, (batch, input_dim), dtype=jnp.float32)
    params = init_params(key, input_dim, hidden_dim, num_classes)

    ref = reference_mlp(x, params)

    # Default variant: narrow (num_classes-wide) HBM output.
    out = jax.block_until_ready(custom_classification_mlp(x, params))
    np.testing.assert_allclose(np.asarray(out), np.asarray(ref),
                               rtol=1e-5, atol=1e-5)

    # Lane-dense (padded) output variant, kept for benchmarking sweeps.
    out_ld = jax.block_until_ready(
        custom_classification_mlp(x, params, lane_dense_output=True))
    np.testing.assert_allclose(np.asarray(out_ld), np.asarray(ref),
                               rtol=1e-5, atol=1e-5)

    # Batch not a multiple of 8 / spanning >= 2 grid steps (exercises the new
    # tiling math and the v7x >=2-step guarantee).
    key, kx2 = jax.random.split(key)
    x2 = jax.random.normal(kx2, (37, input_dim), dtype=jnp.float32)
    out2 = jax.block_until_ready(custom_classification_mlp(x2, params))
    np.testing.assert_allclose(np.asarray(out2),
                               np.asarray(reference_mlp(x2, params)),
                               rtol=1e-5, atol=1e-5)

    print("KERNEL_OK")
</pallas_src>

<mosaic_0001>
module attributes {stable_mosaic.version = 11 : i64} {
  func.func @mlp_kernel(%arg0: i32, %arg1: memref<8x32xf32, #tpu.memory_space<vmem>>, %arg2: memref<32x64xf32, #tpu.memory_space<vmem>>, %arg3: memref<1x64xf32, #tpu.memory_space<vmem>>, %arg4: memref<64x32xf32, #tpu.memory_space<vmem>>, %arg5: memref<1x32xf32, #tpu.memory_space<vmem>>, %arg6: memref<32x128xf32, #tpu.memory_space<vmem>>, %arg7: memref<1x128xf32, #tpu.memory_space<vmem>>, %arg8: memref<8x10xf32, #tpu.memory_space<vmem>>) attributes {dimension_semantics = [#tpu.dimension_semantics<parallel>], iteration_bounds = array<i64: 1>, scalar_prefetch = 0 : i64, scratch_operands = 0 : i64, tpu.core_type = #tpu.core_type<tc>, window_params = [{transform_indices = @transform_0, window_bounds = array<i64: 8, 32>}, {pipeline_mode = #tpu.pipeline_mode<synchronous>, transform_indices = @transform_1, window_bounds = array<i64: 32, 64>}, {pipeline_mode = #tpu.pipeline_mode<synchronous>, transform_indices = @transform_2, window_bounds = array<i64: 1, 64>}, {pipeline_mode = #tpu.pipeline_mode<synchronous>, transform_indices = @transform_3, window_bounds = array<i64: 64, 32>}, {pipeline_mode = #tpu.pipeline_mode<synchronous>, transform_indices = @transform_4, window_bounds = array<i64: 1, 32>}, {pipeline_mode = #tpu.pipeline_mode<synchronous>, transform_indices = @transform_5, window_bounds = array<i64: 32, 128>}, {pipeline_mode = #tpu.pipeline_mode<synchronous>, transform_indices = @transform_6, window_bounds = array<i64: 1, 128>}, {transform_indices = @transform_7, window_bounds = array<i64: 8, 10>}]} {
    %c0 = arith.constant 0 : index
    %c0_0 = arith.constant 0 : index
    %0 = vector.load %arg1[%c0, %c0_0] : memref<8x32xf32, #tpu.memory_space<vmem>>, vector<8x32xf32>
    %c0_1 = arith.constant 0 : index
    %c0_2 = arith.constant 0 : index
    %1 = vector.load %arg2[%c0_1, %c0_2] : memref<32x64xf32, #tpu.memory_space<vmem>>, vector<32x64xf32>
    %cst = arith.constant dense<0.000000e+00> : vector<8x64xf32>
    %2 = tpu.matmul %0, %1, %cst {dimension_numbers = #tpu.dot_dimension_numbers<[1], [0], [0], [1], [0, 0, 1, 1], [], []>, precision = #tpu.contract_precision<fp32>} : vector<8x32xf32>, vector<32x64xf32>, vector<8x64xf32> -> vector<8x64xf32>
    %c0_3 = arith.constant 0 : index
    %c0_4 = arith.constant 0 : index
    %3 = vector.load %arg3[%c0_3, %c0_4] : memref<1x64xf32, #tpu.memory_space<vmem>>, vector<1x64xf32>
    %4 = vector.broadcast %3 : vector<1x64xf32> to vector<8x64xf32>
    %5 = arith.addf %2, %4 : vector<8x64xf32>
    %cst_5 = arith.constant 0.000000e+00 : f32
    %6 = vector.broadcast %cst_5 : f32 to vector<8x64xf32>
    %7 = arith.maximumf %5, %6 : vector<8x64xf32>
    %c0_6 = arith.constant 0 : index
    %c0_7 = arith.constant 0 : index
    %8 = vector.load %arg4[%c0_6, %c0_7] : memref<64x32xf32, #tpu.memory_space<vmem>>, vector<64x32xf32>
    %cst_8 = arith.constant dense<0.000000e+00> : vector<8x32xf32>
    %9 = tpu.matmul %7, %8, %cst_8 {dimension_numbers = #tpu.dot_dimension_numbers<[1], [0], [0], [1], [0, 0, 1, 1], [], []>, precision = #tpu.contract_precision<fp32>} : vector<8x64xf32>, vector<64x32xf32>, vector<8x32xf32> -> vector<8x32xf32>
    %c0_9 = arith.constant 0 : index
    %c0_10 = arith.constant 0 : index
    %10 = vector.load %arg5[%c0_9, %c0_10] : memref<1x32xf32, #tpu.memory_space<vmem>>, vector<1x32xf32>
    %11 = vector.broadcast %10 : vector<1x32xf32> to vector<8x32xf32>
    %12 = arith.addf %9, %11 : vector<8x32xf32>
    %cst_11 = arith.constant 0.000000e+00 : f32
    %13 = vector.broadcast %cst_11 : f32 to vector<8x32xf32>
    %14 = arith.maximumf %12, %13 : vector<8x32xf32>
    %c0_12 = arith.constant 0 : index
    %c0_13 = arith.constant 0 : index
    %15 = vector.load %arg6[%c0_12, %c0_13] : memref<32x128xf32, #tpu.memory_space<vmem>>, vector<32x128xf32>
    %cst_14 = arith.constant dense<0.000000e+00> : vector<8x128xf32>
    %16 = tpu.matmul %14, %15, %cst_14 {dimension_numbers = #tpu.dot_dimension_numbers<[1], [0], [0], [1], [0, 0, 1, 1], [], []>, precision = #tpu.contract_precision<fp32>} : vector<8x32xf32>, vector<32x128xf32>, vector<8x128xf32> -> vector<8x128xf32>
    %c0_15 = arith.constant 0 : index
    %c0_16 = arith.constant 0 : index
    %17 = vector.load %arg7[%c0_15, %c0_16] : memref<1x128xf32, #tpu.memory_space<vmem>>, vector<1x128xf32>
    %18 = vector.broadcast %17 : vector<1x128xf32> to vector<8x128xf32>
    %19 = arith.addf %16, %18 : vector<8x128xf32>
    %20 = vector.extract_strided_slice %19 {offsets = [0, 0], sizes = [8, 10], strides = [1, 1]} : vector<8x128xf32> to vector<8x10xf32>
    %c0_17 = arith.constant 0 : index
    %c0_18 = arith.constant 0 : index
    %21 = vector.load %arg8[%c0_17, %c0_18] : memref<8x10xf32, #tpu.memory_space<vmem>>, vector<8x10xf32>
    tpu.vector_store %arg8[%c0_17, %c0_18], %20 {strides = array<i32>} : memref<8x10xf32, #tpu.memory_space<vmem>>, vector<8x10xf32>,
    return
  }
  func.func @transform_0(%arg0: i32) -> (i32, i32) {
    %c0_i32 = arith.constant 0 : i32
    %c0_i32_0 = arith.constant 0 : i32
    return %arg0, %c0_i32 : i32, i32
  }
  func.func @transform_1(%arg0: i32) -> (i32, i32) {
    %c0_i32 = arith.constant 0 : i32
    %c0_i32_0 = arith.constant 0 : i32
    %c0_i32_1 = arith.constant 0 : i32
    return %c0_i32, %c0_i32_0 : i32, i32
  }
  func.func @transform_2(%arg0: i32) -> (i32, i32) {
    %c0_i32 = arith.constant 0 : i32
    %c0_i32_0 = arith.constant 0 : i32
    %c0_i32_1 = arith.constant 0 : i32
    return %c0_i32, %c0_i32_0 : i32, i32
  }
  func.func @transform_3(%arg0: i32) -> (i32, i32) {
    %c0_i32 = arith.constant 0 : i32
    %c0_i32_0 = arith.constant 0 : i32
    %c0_i32_1 = arith.constant 0 : i32
    return %c0_i32, %c0_i32_0 : i32, i32
  }
  func.func @transform_4(%arg0: i32) -> (i32, i32) {
    %c0_i32 = arith.constant 0 : i32
    %c0_i32_0 = arith.constant 0 : i32
    %c0_i32_1 = arith.constant 0 : i32
    return %c0_i32, %c0_i32_0 : i32, i32
  }
  func.func @transform_5(%arg0: i32) -> (i32, i32) {
    %c0_i32 = arith.constant 0 : i32
    %c0_i32_0 = arith.constant 0 : i32
    %c0_i32_1 = arith.constant 0 : i32
    return %c0_i32, %c0_i32_0 : i32, i32
  }
  func.func @transform_6(%arg0: i32) -> (i32, i32) {
    %c0_i32 = arith.constant 0 : i32
    %c0_i32_0 = arith.constant 0 : i32
    %c0_i32_1 = arith.constant 0 : i32
    return %c0_i32, %c0_i32_0 : i32, i32
  }
  func.func @transform_7(%arg0: i32) -> (i32, i32) {
    %c0_i32 = arith.constant 0 : i32
    %c0_i32_0 = arith.constant 0 : i32
    return %arg0, %c0_i32 : i32, i32
  }
}

</mosaic_0001>

<bundles_post_ra>
// kernel: tpu_custom_call.1
= control target key start
LH: loop header
LB: loop body
LE: loop exit
PB: predicated region body
PF: predicated region fallthrough
CT: control target
= control target key end

     0   :  { %vm39_vm0 = vcmask 261120   ;;  %v1989_v3 = vmov 0.0   ;;  %vm1990_vm1 = vmmov 0   ;;  %s2445_s0 = inlined_call_operand.vmem [shape: f32[8,32], index: 0, kind: input, shape index: {}]   ;;  %s2446_s1 = inlined_call_operand.vmem [shape: f32[32,64], index: 1, kind: input, shape index: {}]   ;;  %s2447_s2 = inlined_call_operand.vmem [shape: f32[1,64], index: 2, kind: input, shape index: {}]   ;;  %s2448_s3 = inlined_call_operand.vmem [shape: f32[64,32], index: 3, kind: input, shape index: {}]   ;;  %s2449_s4 = inlined_call_operand.vmem [shape: f32[1,32], index: 4, kind: input, shape index: {}]   ;;  %s2450_s5 = inlined_call_operand.vmem [shape: f32[32,128], index: 5, kind: input, shape index: {}]   ;;  %s2451_s6 = inlined_call_operand.vmem [shape: f32[1,128], index: 6, kind: input, shape index: {}]   ;;  %s2452_s7 = inlined_call_operand.hbm [shape: f32[8,10], index: 7, kind: output, shape index: {}]  }
   0x1   :  { %v31_v0 = vld [vmem:[%s2446_s1 + $0x18] sm:$0xff]  ;;  %v30_v1 = vld [vmem:[%s2446_s1 + $0x10] sm:$0xff]  ;;  %v29_v2 = vld [vmem:[%s2446_s1 + $0x8] sm:$0xff]  ;;  %1718 = vmatprep.subr.mxu0 %v1989_v3  ;;  %1729 = vmatprep.subr.mxu1 %v1989_v3 }
   0x2   :  { %v2042_v4 = vand.u32 4294901760, %v31_v0  ;;  %v2044_v5 = vand.u32 4294901760, %v30_v1  ;;  %v2046_v6 = vand.u32 4294901760, %v29_v2  ;;  %v28_v7 = vld [vmem:[%s2446_s1] sm:$0xff]  ;;  %1726 = vmatprep.mubr.msk.f32.mxu0 %vm1990_vm1, %v1989_v3  ;;  %1737 = vmatprep.mubr.msk.f32.mxu1 %vm1990_vm1, %v1989_v3 }
   0x3   :  { %v27_v8 = vld [vmem:[%s2445_s0] sm:$0xff]  ;;  %v2055_v9 = vand.u32 4294901760, %v28_v7 }
   0x4   :  { %v41_v10 = vsel %vm39_vm0, %v27_v8, 0 }
   0x5   :  { %12 = vsyncpa [#allocation3], 0  ;;  %1719 = vmatpush3.msra.mxu0 %v2042_v4  ;;  %v148_v11 = vsub.f32 %v31_v0, %v2042_v4  ;;  %v2064_v12 = vand.u32 4294901760, %v41_v10  ;;  %v155_v13 = vsub.f32 %v30_v1, %v2044_v5  ;;  %v162_v14 = vsub.f32 %v29_v2, %v2046_v6  ;;  %v536_v32 = vld [vmem:[%s2448_s3 + $0x38] sm:$0xff]  ;;  %v535_v34 = vld [vmem:[%s2448_s3 + $0x30] sm:$0xff]  ;;  %s1991_s1 = smov [#allocation2]  }
   0x6   :  { %1720 = vmatprep.subr.mxu0 %v1989_v3  ;;  %v169_v15 = vsub.f32 %v28_v7, %v2055_v9  ;;  %v2123_v33 = vand.u32 4294901760, %v536_v32  ;;  %v2131_v36 = vand.u32 4294901760, %v535_v34  ;;  %v534_v37 = vld [vmem:[%s2448_s3 + $0x28] sm:$0xff]  ;;  %v533_v41 = vld [vmem:[%s2448_s3 + $0x20] sm:$0xff]  ;;  %v532_v46 = vld [vmem:[%s2448_s3 + $0x18] sm:$0xff]  ;;  %vm544_vm2 = vcmask 523264  }
   0x7   :  { %1721 = vmatpush3.msra.mxu0 %v2044_v5  ;;  %v149_v16 = vand.u32 4294901760, %v148_v11  ;;  %v113_v17 = vsub.f32 %v41_v10, %v2064_v12  ;;  %v156_v18 = vand.u32 4294901760, %v155_v13  ;;  %v163_v19 = vand.u32 4294901760, %v162_v14  ;;  %v531_v52 = vld [vmem:[%s2448_s3 + $0x10] sm:$0xff]  ;;  %v530_v58 = vld [vmem:[%s2448_s3 + $0x8] sm:$0xff]  ;;  %v529_v0 = vld [vmem:[%s2448_s3] sm:$0xff] }
   0x8   :  { %1722 = vmatprep.subr.mxu0 %v1989_v3  ;;  %v170_v20 = vand.u32 4294901760, %v169_v15  ;;  %v2129_v35 = vsub.f32 %v536_v32, %v2123_v33  ;;  %v2140_v39 = vsub.f32 %v535_v34, %v2131_v36  ;;  %v2142_v40 = vand.u32 4294901760, %v534_v37  ;;  %s1593_s11 = sshll.u32 %s1991_s1, 4  ;;  %s1594_s11 = int_to_ptr.vmem [resolvable:$true] %s1593_s11 }
   0x9   :  { %1723 = vmatpush3.msra.mxu0 %v2046_v6  ;;  %v150_v21 = vsub.f32 %v148_v11, %v149_v16  ;;  %v114_v22 = vand.u32 4294901760, %v113_v17  ;;  %v157_v23 = vsub.f32 %v155_v13, %v156_v18  ;;  %v164_v24 = vsub.f32 %v162_v14, %v163_v19  ;;  %s1967_s12 = scalar_lea.vmem %s1594_s11, 128  ;;  %p1972_p1 = scmp.lt.s32.totalorder %s1594_s11, %s1594_s11 }
   0xa   :  { %1724 = vmatprep.subr.mxu0 %v1989_v3  ;;  %v171_v28 = vsub.f32 %v169_v15, %v170_v20  ;;  %v650_v38 = vand.u32 4294901760, %v2129_v35  ;;  %v657_v43 = vand.u32 4294901760, %v2140_v39  ;;  %v2154_v44 = vsub.f32 %v534_v37, %v2142_v40  ;;  %p1968_p0 = scmp.ne.s32.totalorder %s1594_s11, %s1967_s12  ;;  %p1973_p2 = scmp.lt.s32.totalorder %s1967_s12, %s1967_s12 }
   0xb   :  { %1725 = vmatpush3.msra.mxu0 %v2055_v9  ;;  %v151_v25 = vand.u32 4294901760, %v150_v21  ;;  %v115_v26 = vsub.f32 %v113_v17, %v114_v22  ;;  %v158_v27 = vand.u32 4294901760, %v157_v23  ;;  %v165_v30 = vand.u32 4294901760, %v164_v24 }
   0xc   :  { %1740 = vmatprep.subr.mxu0 %v1989_v3  ;;  %v172_v31 = vand.u32 4294901760, %v171_v28  ;;  %v651_v42 = vsub.f32 %v2129_v35, %v650_v38  ;;  %v2156_v45 = vand.u32 4294901760, %v533_v41  ;;  %v658_v48 = vsub.f32 %v2140_v39, %v657_v43  ;;  %p1974_p3 = por %p1973_p2, %p1972_p1 }
   0xd   :  { %1730 = vmatpush3.msra.mxu1 %v151_v25  ;;  %v116_v29 = vand.u32 4294901760, %v115_v26  ;;  %v664_v49 = vand.u32 4294901760, %v2154_v44  ;;  %v2171_v51 = vand.u32 4294901760, %v532_v46  ;;  %v2181_v56 = vand.u32 4294901760, %v531_v52 }
   0xe   :  { %1731 = vmatprep.subr.mxu1 %v1989_v3  ;;  %v652_v47 = vand.u32 4294901760, %v651_v42  ;;  %v2168_v50 = vsub.f32 %v533_v41, %v2156_v45  ;;  %v659_v53 = vand.u32 4294901760, %v658_v48  ;;  %v2197_v62 = vand.u32 4294901760, %v530_v58  ;;  %p1975_p4 = pnand %p1974_p3, %p1968_p0 }
   0xf   :  { %1727 = vmatmul.mubr.f32.vlgmr.msra.gmra.mxu0 %v116_v29  ;;  %1732 = vmatpush3.msra.mxu1 %v158_v27  ;;  %v665_v54 = vsub.f32 %v2154_v44, %v664_v49  ;;  %v2185_v57 = vsub.f32 %v532_v46, %v2171_v51  ;;  %v2195_v61 = vsub.f32 %v531_v52, %v2181_v56  ;;  %vm1585_vm3 = vcmask 80896  }
  0x10   :  { %1741 = vmatpush3.msra.mxu0 %v148_v11  ;;  %1733 = vmatprep.subr.mxu1 %v1989_v3  ;;  %v671_v55 = vand.u32 4294901760, %v2168_v50 }
  0x11   :  { %1742 = vmatprep.subr.mxu0 %v1989_v3  ;;  %1734 = vmatpush3.msra.mxu1 %v165_v30  ;;  %v666_v59 = vand.u32 4294901760, %v665_v54  ;;  %v678_v63 = vand.u32 4294901760, %v2185_v57  ;;  %v685_v2 = vand.u32 4294901760, %v2195_v61 }
  0x12   :  { %1743 = vmatpush3.msra.mxu0 %v155_v13  ;;  %1735 = vmatprep.subr.mxu1 %v1989_v3  ;;  %v672_v60 = vsub.f32 %v2168_v50, %v671_v55 }
  0x13   :  { %1744 = vmatprep.subr.mxu0 %v1989_v3  ;;  %1736 = vmatpush3.msra.mxu1 %v172_v31  ;;  %v686_v7 = vsub.f32 %v2195_v61, %v685_v2 }
  0x14   :  { %1745 = vmatpush3.msra.mxu0 %v162_v14  ;;  %1738 = vmatmul.mubr.f32.vlgmr.msra.gmra.mxu1 %v2064_v12  ;;  %v673_v1 = vand.u32 4294901760, %v672_v60 }
  0x15   :  { %1746 = vmatprep.subr.mxu0 %v1989_v3  ;;  %1751 = vmatprep.subr.mxu1 %v1989_v3  ;;  %v687_v11 = vand.u32 4294901760, %v686_v7 }
  0x16   :  { %1747 = vmatpush3.msra.mxu0 %v169_v15  ;;  %1752 = vmatpush3.msra.mxu1 %v2042_v4 }
  0x17   :  { %1748 = vmatprep.mubr.msk.f32.mxu0 %vm1990_vm1, %v1989_v3  ;;  %1753 = vmatprep.subr.mxu1 %v1989_v3 }
  0x18   :  { %1762 = vmatprep.subr.mxu0 %v1989_v3  ;;  %1749 = vmatmul.mubr.f32.vlgmr.msra.gmra.mxu0 %v113_v17 }
  0x19   :  { %1754 = vmatpush3.msra.mxu1 %v2044_v5  ;;  %1763 = vmatpush3.msra.mxu0 %v149_v16 }
  0x1a   :  { %1755 = vmatprep.subr.mxu1 %v1989_v3  ;;  %1764 = vmatprep.subr.mxu0 %v1989_v3 }
  0x1b   :  { %1756 = vmatpush3.msra.mxu1 %v2046_v6  ;;  %1765 = vmatpush3.msra.mxu0 %v156_v18 }
  0x1c   :  { %1757 = vmatprep.subr.mxu1 %v1989_v3  ;;  %1766 = vmatprep.subr.mxu0 %v1989_v3 }
  0x1d   :  { %1758 = vmatpush3.msra.mxu1 %v2055_v9  ;;  %1759 = vmatprep.mubr.msk.f32.mxu1 %vm1990_vm1, %v1989_v3 }
  0x1e   :  { %1767 = vmatpush3.msra.mxu0 %v163_v19  ;;  %1760 = vmatmul.mubr.f32.vlgmr.msra.gmra.mxu1 %v114_v22 }
  0x1f   :  { %1768 = vmatprep.subr.mxu0 %v1989_v3  ;;  %1773 = vmatprep.subr.mxu1 %v1989_v3 }
  0x20   :  { %1769 = vmatpush3.msra.mxu0 %v170_v20  ;;  %1770 = vmatprep.mubr.msk.f32.mxu0 %vm1990_vm1, %v1989_v3  ;;  %v1601_v20 = vld [vmem:[%s2447_s2] ss:$0 sm:$0xff] }
  0x21   :  { %1774 = vmatpush3.msra.mxu1 %v2042_v4  ;;  %1771 = vmatmul.mubr.f32.vlgmr.msra.gmra.mxu0 %v2064_v12  ;;  %v2208_v4 = vsub.f32 %v530_v58, %v2197_v62 }
  0x22   :  { %1775 = vmatprep.subr.mxu1 %v1989_v3  ;;  %1781 = vmatprep.mubr.msk.f32.mxu1 %vm1990_vm1, %v1989_v3 }
  0x23   :  { %1776 = vmatpush3.msra.mxu1 %v2044_v5  ;;  %1784 = vmatprep.subr.mxu0 %v1989_v3  ;;  %v2210_v5 = vand.u32 4294901760, %v529_v0  ;;  %v692_v8 = vand.u32 4294901760, %v2208_v4 }
  0x24   :  { %1777 = vmatprep.subr.mxu1 %v1989_v3  ;;  %1800 = vmatprep.mubr.msk.f32.mxu0 %vm1990_vm1, %v1989_v3 }
  0x25   :  { %1778 = vmatpush3.msra.mxu1 %v2046_v6  ;;  %1785 = vmatpush3.msra.mxu0 %v2123_v33  ;;  %v679_v6 = vsub.f32 %v2185_v57, %v678_v63 }
  0x26   :  { %1779 = vmatprep.subr.mxu1 %v1989_v3  ;;  %1786 = vmatprep.subr.mxu0 %v1989_v3 }
  0x27   :  { %1780 = vmatpush3.msra.mxu1 %v2055_v9  ;;  %1787 = vmatpush3.msra.mxu0 %v2131_v36  ;;  %v2223_v9 = vsub.f32 %v529_v0, %v2210_v5  ;;  %v680_v10 = vand.u32 4294901760, %v679_v6 }
  0x28   :  { %1782 = vmatmul.mubr.f32.vlgmr.msra.gmra.mxu1 %v2064_v12  ;;  %1803 = vmatprep.subr.mxu1 %v1989_v3  ;;  %v693_v12 = vsub.f32 %v2208_v4, %v692_v8 }
  0x29   :  { %1819 = vmatprep.mubr.msk.f32.mxu1 %vm1990_vm1, %v1989_v3  ;;  %1788 = vmatprep.subr.mxu0 %v1989_v3  ;;  %v699_v13 = vand.u32 4294901760, %v2223_v9 }
  0x2a   :  { %1789 = vmatpush3.msra.mxu0 %v2142_v40  ;;  %1804 = vmatpush3.msra.mxu1 %v652_v47  ;;  %v694_v14 = vand.u32 4294901760, %v693_v12  ;;  %v1602_v12 = vld [vmem:[%s2449_s4] ss:$0 sm:$0xff] }
  0x2b   :  { %1790 = vmatprep.subr.mxu0 %v1989_v3  ;;  %1805 = vmatprep.subr.mxu1 %v1989_v3  ;;  %v700_v15 = vsub.f32 %v2223_v9, %v699_v13 }
  0x2c   :  { %1791 = vmatpush3.msra.mxu0 %v2156_v45  ;;  %1806 = vmatpush3.msra.mxu1 %v659_v53 }
  0x2d   :  { %1792 = vmatprep.subr.mxu0 %v1989_v3  ;;  %1807 = vmatprep.subr.mxu1 %v1989_v3  ;;  %v701_v16 = vand.u32 4294901760, %v700_v15 }
  0x2e   :  { %1793 = vmatpush3.msra.mxu0 %v2171_v51  ;;  %1808 = vmatpush3.msra.mxu1 %v666_v59 }
  0x2f   :  { %1794 = vmatprep.subr.mxu0 %v1989_v3  ;;  %1809 = vmatprep.subr.mxu1 %v1989_v3 }
  0x30   :  { %1795 = vmatpush3.msra.mxu0 %v2181_v56  ;;  %1810 = vmatpush3.msra.mxu1 %v673_v1 }
  0x31   :  { %1796 = vmatprep.subr.mxu0 %v1989_v3  ;;  %1811 = vmatprep.subr.mxu1 %v1989_v3 }
  0x32   :  { %1797 = vmatpush3.msra.mxu0 %v2197_v62  ;;  %1812 = vmatpush3.msra.mxu1 %v680_v10 }
  0x33   :  { %1798 = vmatprep.subr.mxu0 %v1989_v3  ;;  %1813 = vmatprep.subr.mxu1 %v1989_v3 }
  0x34   :  { %1799 = vmatpush3.msra.mxu0 %v2210_v5  ;;  %1814 = vmatpush3.msra.mxu1 %v687_v11 }
  0x35   :  { %1822 = vmatprep.subr.mxu0 %v1989_v3  ;;  %1815 = vmatprep.subr.mxu1 %v1989_v3 }
  0x36   :  { %1816 = vmatpush3.msra.mxu1 %v694_v14 }
  0x37   :  { %1817 = vmatprep.subr.mxu1 %v1989_v3 }
  0x38   :  { %1818 = vmatpush3.msra.mxu1 %v701_v16 }
  0x39   :  { %1841 = vmatprep.subr.mxu1 %v1989_v3 }
  0xcf   :  { %v118_v17 = vpop.f32.mrf.mxu0 }
  0xd0   :  { %v119_v23 = vadd.f32 %v1601_v20, %v118_v17 }
  0xd1   :  { %v1728_v18 = vpop.f32.mrf.mxu0 }
  0xd4   :  { %v209_v19 = vpop.f32.mrf.mxu1 }
  0xd5   :  { %v210_v25 = vadd.f32 %v209_v19, %v119_v23 }
  0xd6   :  { %v1739_v21 = vpop.f32.mrf.mxu1 }
  0xd8   :  { %v289_v22 = vpop.f32.mrf.mxu0 }
  0xd9   :  { %v290_v28 = vadd.f32 %v289_v22, %v210_v25 }
  0xda   :  { %v1750_v24 = vpop.f32.mrf.mxu0 }
  0xde   :  { %v366_v26 = vpop.f32.mrf.mxu1 }
  0xdf   :  { %v367_v30 = vadd.f32 %v366_v26, %v290_v28 }
  0xe0   :  { %v1761_v27 = vpop.f32.mrf.mxu1 }
  0xe1   :  { %v449_v29 = vpop.f32.mrf.mxu0 }
  0xe2   :  { %v450_v32 = vadd.f32 %v449_v29, %v367_v30 }
  0xe3   :  { %v1772_v31 = vpop.f32.mrf.mxu0 }
  0xe8   :  { %v524_v34 = vpop.f32.mrf.mxu1 }
  0xe9   :  { %v525_v37 = vadd.f32 %v524_v34, %v450_v32 }
  0xea   :  { %v1783_v41 = vpop.f32.mrf.mxu1 }
  0xeb   :  { %v528_v42 = vmax.f32 %v525_v37, 0.0 }
  0xed   :  { %v546_v46 = vsel %vm544_vm2, %v528_v42, 0  ;;  %v1603_v42 = vld [vmem:[%s2451_s6] ss:$0 sm:$0xff] }
  0xee   :  { %v2243_v47 = vand.u32 4294901760, %v546_v46 }
  0xf0   :  { %v622_v48 = vsub.f32 %v546_v46, %v2243_v47  ;;  %1820 = vmatmul.mubr.f32.vlgmr.msra.gmra.mxu1 %v2243_v47 }
  0xf1   :  { %1842 = vmatpush3.msra.mxu1 %v2123_v33  ;;  %1857 = vmatprep.mubr.msk.f32.mxu1 %vm1990_vm1, %v1989_v3 }
  0xf2   :  { %v623_v52 = vand.u32 4294901760, %v622_v48  ;;  %1843 = vmatprep.subr.mxu1 %v1989_v3 }
  0xf3   :  { %1844 = vmatpush3.msra.mxu1 %v2131_v36 }
  0xf4   :  { %1845 = vmatprep.subr.mxu1 %v1989_v3  ;;  %v624_v53 = vsub.f32 %v622_v48, %v623_v52 }
  0xf5   :  { %1846 = vmatpush3.msra.mxu1 %v2142_v40 }
  0xf6   :  { %1847 = vmatprep.subr.mxu1 %v1989_v3  ;;  %v625_v54 = vand.u32 4294901760, %v624_v53 }
  0xf7   :  { %1848 = vmatpush3.msra.mxu1 %v2156_v45 }
  0xf8   :  { %1849 = vmatprep.subr.mxu1 %v1989_v3  ;;  %1801 = vmatmul.mubr.f32.vlgmr.msra.gmra.mxu0 %v625_v54 }
  0xf9   :  { %1823 = vmatpush3.msra.mxu0 %v2129_v35  ;;  %1850 = vmatpush3.msra.mxu1 %v2171_v51 }
  0xfa   :  { %1824 = vmatprep.subr.mxu0 %v1989_v3  ;;  %1851 = vmatprep.subr.mxu1 %v1989_v3 }
  0xfb   :  { %1825 = vmatpush3.msra.mxu0 %v2140_v39  ;;  %1852 = vmatpush3.msra.mxu1 %v2181_v56 }
  0xfc   :  { %1826 = vmatprep.subr.mxu0 %v1989_v3  ;;  %1853 = vmatprep.subr.mxu1 %v1989_v3 }
  0xfd   :  { %1827 = vmatpush3.msra.mxu0 %v2154_v44  ;;  %1854 = vmatpush3.msra.mxu1 %v2197_v62 }
  0xfe   :  { %1828 = vmatprep.subr.mxu0 %v1989_v3  ;;  %1855 = vmatprep.subr.mxu1 %v1989_v3 }
  0xff   :  { %1829 = vmatpush3.msra.mxu0 %v2168_v50  ;;  %1856 = vmatpush3.msra.mxu1 %v2210_v5 }
 0x100   :  { %1830 = vmatprep.subr.mxu0 %v1989_v3  ;;  %1858 = vmatmul.mubr.f32.vlgmr.msra.gmra.mxu1 %v623_v52 }
 0x101   :  { %1879 = vmatprep.subr.mxu1 %v1989_v3  ;;  %1831 = vmatpush3.msra.mxu0 %v2185_v57 }
 0x102   :  { %1880 = vmatpush3.msra.mxu1 %v2123_v33  ;;  %1832 = vmatprep.subr.mxu0 %v1989_v3  ;;  %v1089_v33 = vld [vmem:[%s2450_s5 + $0x18] sm:$0xff] }
 0x103   :  { %1881 = vmatprep.subr.mxu1 %v1989_v3  ;;  %1833 = vmatpush3.msra.mxu0 %v2195_v61  ;;  %v2336_v35 = vand.u32 4294901760, %v1089_v33 }
 0x104   :  { %1882 = vmatpush3.msra.mxu1 %v2131_v36  ;;  %1834 = vmatprep.subr.mxu0 %v1989_v3  ;;  %v1088_v36 = vld [vmem:[%s2450_s5 + $0x10] sm:$0xff] }
 0x105   :  { %1883 = vmatprep.subr.mxu1 %v1989_v3  ;;  %1835 = vmatpush3.msra.mxu0 %v2208_v4  ;;  %v2344_v39 = vand.u32 4294901760, %v1088_v36 }
 0x106   :  { %1884 = vmatpush3.msra.mxu1 %v2142_v40  ;;  %1836 = vmatprep.subr.mxu0 %v1989_v3  ;;  %v1087_v40 = vld [vmem:[%s2450_s5 + $0x8] sm:$0xff] }
 0x107   :  { %1885 = vmatprep.subr.mxu1 %v1989_v3  ;;  %1837 = vmatpush3.msra.mxu0 %v2223_v9  ;;  %v2353_v44 = vsub.f32 %v1088_v36, %v2344_v39 }
 0x108   :  { %1838 = vmatprep.mubr.msk.f32.mxu0 %vm1990_vm1, %v1989_v3  ;;  %1886 = vmatpush3.msra.mxu1 %v2156_v45  ;;  %v2355_v45 = vand.u32 4294901760, %v1087_v40 }
 0x109   :  { %1839 = vmatmul.mubr.f32.vlgmr.msra.gmra.mxu0 %v622_v48  ;;  %1860 = vmatprep.subr.mxu0 %v1989_v3 }
 0x10a   :  { %1887 = vmatprep.subr.mxu1 %v1989_v3  ;;  %1861 = vmatpush3.msra.mxu0 %v650_v38  ;;  %v2342_v38 = vsub.f32 %v1089_v33, %v2336_v35 }
 0x10b   :  { %1888 = vmatpush3.msra.mxu1 %v2171_v51  ;;  %1862 = vmatprep.subr.mxu0 %v1989_v3  ;;  %v1213_v51 = vand.u32 4294901760, %v2353_v44 }
 0x10c   :  { %1889 = vmatprep.subr.mxu1 %v1989_v3  ;;  %1863 = vmatpush3.msra.mxu0 %v657_v43  ;;  %v1206_v43 = vand.u32 4294901760, %v2342_v38 }
 0x10d   :  { %1890 = vmatpush3.msra.mxu1 %v2181_v56  ;;  %1864 = vmatprep.subr.mxu0 %v1989_v3  ;;  %v1214_v58 = vsub.f32 %v2353_v44, %v1213_v51 }
 0x10e   :  { %1891 = vmatprep.subr.mxu1 %v1989_v3  ;;  %1865 = vmatpush3.msra.mxu0 %v664_v49  ;;  %v1086_v49 = vld [vmem:[%s2450_s5] sm:$0xff]  ;;  %v1207_v50 = vsub.f32 %v2342_v38, %v1206_v43 }
 0x10f   :  { %1892 = vmatpush3.msra.mxu1 %v2197_v62  ;;  %1866 = vmatprep.subr.mxu0 %v1989_v3  ;;  %v2369_v56 = vand.u32 4294901760, %v1086_v49  ;;  %v1215_v61 = vand.u32 4294901760, %v1214_v58 }
 0x110   :  { %1893 = vmatprep.subr.mxu1 %v1989_v3  ;;  %1867 = vmatpush3.msra.mxu0 %v671_v55  ;;  %v2367_v55 = vsub.f32 %v1087_v40, %v2355_v45  ;;  %v1208_v57 = vand.u32 4294901760, %v1207_v50 }
 0x111   :  { %1894 = vmatpush3.msra.mxu1 %v2210_v5  ;;  %1895 = vmatprep.mubr.msk.f32.mxu1 %vm1990_vm1, %v1989_v3  ;;  %v2378_v60 = vsub.f32 %v1086_v49, %v2369_v56 }
 0x112   :  { %1868 = vmatprep.subr.mxu0 %v1989_v3  ;;  %1896 = vmatmul.mubr.f32.vlgmr.msra.gmra.mxu1 %v2243_v47  ;;  %v1220_v59 = vand.u32 4294901760, %v2367_v55 }
 0x113   :  { %1869 = vmatpush3.msra.mxu0 %v678_v63  ;;  %1876 = vmatprep.mubr.msk.f32.mxu0 %vm1990_vm1, %v1989_v3  ;;  %v1227_v63 = vand.u32 4294901760, %v2378_v60 }
 0x114   :  { %1870 = vmatprep.subr.mxu0 %v1989_v3  ;;  %1909 = vmatprep.subr.mxu1 %v1989_v3  ;;  %v1221_v62 = vsub.f32 %v2367_v55, %v1220_v59 }
 0x115   :  { %1871 = vmatpush3.msra.mxu0 %v685_v2  ;;  %1917 = vmatprep.mubr.msk.f32.mxu1 %vm1990_vm1, %v1989_v3  ;;  %v1228_v1 = vsub.f32 %v2378_v60, %v1227_v63 }
 0x116   :  { %1872 = vmatprep.subr.mxu0 %v1989_v3  ;;  %1910 = vmatpush3.msra.mxu1 %v1208_v57  ;;  %v1222_v0 = vand.u32 4294901760, %v1221_v62 }
 0x117   :  { %1873 = vmatpush3.msra.mxu0 %v692_v8  ;;  %1911 = vmatprep.subr.mxu1 %v1989_v3  ;;  %v1229_v2 = vand.u32 4294901760, %v1228_v1 }
 0x118   :  { %1874 = vmatprep.subr.mxu0 %v1989_v3  ;;  %1912 = vmatpush3.msra.mxu1 %v1215_v61 }
 0x119   :  { %1875 = vmatpush3.msra.mxu0 %v699_v13  ;;  %1913 = vmatprep.subr.mxu1 %v1989_v3 }
 0x11a   :  { %1877 = vmatmul.mubr.f32.vlgmr.msra.gmra.mxu0 %v2243_v47  ;;  %1898 = vmatprep.subr.mxu0 %v1989_v3 }
 0x11b   :  { %1906 = vmatprep.mubr.msk.f32.mxu0 %vm1990_vm1, %v1989_v3  ;;  %1899 = vmatpush3.msra.mxu0 %v2336_v35 }
 0x11c   :  { %1900 = vmatprep.subr.mxu0 %v1989_v3  ;;  %1914 = vmatpush3.msra.mxu1 %v1222_v0 }
 0x11d   :  { %1901 = vmatpush3.msra.mxu0 %v2344_v39  ;;  %1915 = vmatprep.subr.mxu1 %v1989_v3 }
 0x11e   :  { %1902 = vmatprep.subr.mxu0 %v1989_v3  ;;  %1916 = vmatpush3.msra.mxu1 %v1229_v2 }
 0x11f   :  { %1903 = vmatpush3.msra.mxu0 %v2355_v45  ;;  %1931 = vmatprep.subr.mxu1 %v1989_v3 }
 0x120   :  { %1904 = vmatprep.subr.mxu0 %v1989_v3 }
 0x121   :  { %1905 = vmatpush3.msra.mxu0 %v2369_v56 }
 0x122   :  { %1920 = vmatprep.subr.mxu0 %v1989_v3 }
 0x1b0   :  { %v738_v4 = vpop.f32.mrf.mxu1 }
 0x1b2   :  { %v1821_v5 = vpop.f32.mrf.mxu1 }
 0x1b8   :  { %v627_v6 = vpop.f32.mrf.mxu0 }
 0x1b9   :  { %v628_v13 = vadd.f32 %v1602_v12, %v627_v6 }
 0x1ba   :  { %v1802_v7 = vpop.f32.mrf.mxu0 }
 0x1bb   :  { %v739_v15 = vadd.f32 %v738_v4, %v628_v13 }
 0x1c0   :  { %v907_v8 = vpop.f32.mrf.mxu1 }
 0x1c2   :  { %v1859_v9 = vpop.f32.mrf.mxu1 }
 0x1c9   :  { %v826_v10 = vpop.f32.mrf.mxu0 }
 0x1ca   :  { %v827_v17 = vadd.f32 %v826_v10, %v739_v15 }
 0x1cb   :  { %v1840_v11 = vpop.f32.mrf.mxu0 }
 0x1cc   :  { %v908_v18 = vadd.f32 %v907_v8, %v827_v17 }
 0x1d2   :  { %v1081_v14 = vpop.f32.mrf.mxu1 }
 0x1d4   :  { %v1897_v16 = vpop.f32.mrf.mxu1 }
 0x1da   :  { %v1002_v19 = vpop.f32.mrf.mxu0 }
 0x1db   :  { %v1003_v20 = vadd.f32 %v1002_v19, %v908_v18 }
 0x1dc   :  { %v1878_v21 = vpop.f32.mrf.mxu0 }
 0x1dd   :  { %v1082_v22 = vadd.f32 %v1081_v14, %v1003_v20 }
 0x1df   :  { %v1085_v23 = vmax.f32 %v1082_v22, 0.0 }
 0x1e1   :  { %v1098_v24 = vsel %vm39_vm0, %v1085_v23, 0 }
 0x1e2   :  { %v1169_v25 = vand.u32 4294901760, %v1098_v24 }
 0x1e4   :  { %v1170_v26 = vsub.f32 %v1098_v24, %v1169_v25  ;;  %1918 = vmatmul.mubr.f32.vlgmr.msra.gmra.mxu1 %v1169_v25 }
 0x1e5   :  { %1932 = vmatpush3.msra.mxu1 %v2336_v35  ;;  %1939 = vmatprep.mubr.msk.f32.mxu1 %vm1990_vm1, %v1989_v3 }
 0x1e6   :  { %1933 = vmatprep.subr.mxu1 %v1989_v3  ;;  %v1171_v27 = vand.u32 4294901760, %v1170_v26 }
 0x1e7   :  { %1934 = vmatpush3.msra.mxu1 %v2344_v39 }
 0x1e8   :  { %1935 = vmatprep.subr.mxu1 %v1989_v3  ;;  %v1172_v28 = vsub.f32 %v1170_v26, %v1171_v27 }
 0x1e9   :  { %1936 = vmatpush3.msra.mxu1 %v2355_v45 }
 0x1ea   :  { %1937 = vmatprep.subr.mxu1 %v1989_v3  ;;  %v1173_v29 = vand.u32 4294901760, %v1172_v28 }
 0x1eb   :  { %1938 = vmatpush3.msra.mxu1 %v2369_v56 }
 0x1ec   :  { %1940 = vmatmul.mubr.f32.vlgmr.msra.gmra.mxu1 %v1171_v27  ;;  %1953 = vmatprep.subr.mxu1 %v1989_v3 }
 0x1ed   :  { %1907 = vmatmul.mubr.f32.vlgmr.msra.gmra.mxu0 %v1173_v29  ;;  %1954 = vmatpush3.msra.mxu1 %v2336_v35 }
 0x1ee   :  { %1921 = vmatpush3.msra.mxu0 %v2342_v38  ;;  %1955 = vmatprep.subr.mxu1 %v1989_v3 }
 0x1ef   :  { %1922 = vmatprep.subr.mxu0 %v1989_v3  ;;  %1956 = vmatpush3.msra.mxu1 %v2344_v39 }
 0x1f0   :  { %1923 = vmatpush3.msra.mxu0 %v2353_v44  ;;  %1957 = vmatprep.subr.mxu1 %v1989_v3 }
 0x1f1   :  { %1924 = vmatprep.subr.mxu0 %v1989_v3  ;;  %1958 = vmatpush3.msra.mxu1 %v2355_v45 }
 0x1f2   :  { %1925 = vmatpush3.msra.mxu0 %v2367_v55  ;;  %1959 = vmatprep.subr.mxu1 %v1989_v3 }
 0x1f3   :  { %1926 = vmatprep.subr.mxu0 %v1989_v3  ;;  %1928 = vmatprep.mubr.msk.f32.mxu0 %vm1990_vm1, %v1989_v3 }
 0x1f4   :  { %1927 = vmatpush3.msra.mxu0 %v2378_v60  ;;  %1960 = vmatpush3.msra.mxu1 %v2369_v56 }
 0x1f5   :  { %1961 = vmatprep.mubr.msk.f32.mxu1 %vm1990_vm1, %v1989_v3  ;;  %1929 = vmatmul.mubr.f32.vlgmr.msra.gmra.mxu0 %v1170_v26 }
 0x1f6   :  { %1942 = vmatprep.subr.mxu0 %v1989_v3  ;;  %1962 = vmatmul.mubr.f32.vlgmr.msra.gmra.mxu1 %v1169_v25 }
 0x1f7   :  { %1943 = vmatpush3.msra.mxu0 %v1206_v43  ;;  %1950 = vmatprep.mubr.msk.f32.mxu0 %vm1990_vm1, %v1989_v3 }
 0x1f8   :  { %1944 = vmatprep.subr.mxu0 %v1989_v3 }
 0x1f9   :  { %1945 = vmatpush3.msra.mxu0 %v1213_v51 }
 0x1fa   :  { %1946 = vmatprep.subr.mxu0 %v1989_v3 }
 0x1fb   :  { %1947 = vmatpush3.msra.mxu0 %v1220_v59 }
 0x1fc   :  { %1948 = vmatprep.subr.mxu0 %v1989_v3 }
 0x1fd   :  { %1949 = vmatpush3.msra.mxu0 %v1227_v63 }
 0x1fe   :  { %1951 = vmatmul.mubr.f32.vlgmr.msra.gmra.mxu0 %v1169_v25 }
 0x2a4   :  { %v1266_v30 = vpop.f32.mrf.mxu1 }
 0x2a6   :  { %v1919_v31 = vpop.f32.mrf.mxu1 }
 0x2ac   :  { %v1423_v32 = vpop.f32.mrf.mxu1 }
 0x2ad   :  { %v1175_v34 = vpop.f32.mrf.mxu0 }
 0x2ae   :  { %v1941_v37 = vpop.f32.mrf.mxu1  ;;  %v1176_v46 = vadd.f32 %v1603_v42, %v1175_v34 }
 0x2af   :  { %v1908_v41 = vpop.f32.mrf.mxu0 }
 0x2b0   :  { %v1267_v52 = vadd.f32 %v1266_v30, %v1176_v46 }
 0x2b5   :  { %v1346_v47 = vpop.f32.mrf.mxu0 }
 0x2b6   :  { %v1581_v48 = vpop.f32.mrf.mxu1  ;;  %v1347_v54 = vadd.f32 %v1346_v47, %v1267_v52 }
 0x2b7   :  { %v1930_v53 = vpop.f32.mrf.mxu0 }
 0x2b8   :  { %v1963_v3 = vpop.f32.mrf.mxu1  ;;  %v1424_v33 = vadd.f32 %v1423_v32, %v1347_v54 }
 0x2be   :  { %v1506_v35 = vpop.f32.mrf.mxu0 }
 0x2bf   :  { %v1507_v36 = vadd.f32 %v1506_v35, %v1424_v33 }
 0x2c0   :  { %v1952_v38 = vpop.f32.mrf.mxu0 }
 0x2c1   :  { %v1582_v39 = vadd.f32 %v1581_v48, %v1507_v36 }
 0x2c3   :  { %1586 = vst.msk [vmem:[#allocation2] sm:$0xff] %vm1585_vm3, %v1582_v39 }
 0x2c4   :  { %1978 = shalt.err (!%p1975_p4)
}
 0x2c5   :  { %1596 = dma.vmem_to_hbm [thread:$0]  %s1594_s11, 128, %s2452_s7, [#allocation3]  }
 0x2c6   :  { %1987 = dma.done.wait [#allocation3], 128  }
 0x2c7   :  { %1988 = vsyncadd [#allocation3], 4294967168 }
 0x2c8   :  { %1600 = vsyncpa [#allocation3], 1 }

</bundles_post_ra>
